<compile_context>
chip_gen: v5e
topology: v5e:2x2
jax: 0.10.0
libtpu: 0.0.40
codegen_flags: <defaults>
</compile_context>

<pallas_src>
import functools

import jax
import jax.numpy as jnp
from jax.experimental import pallas as pl
from jax.experimental.pallas import tpu as pltpu


# --------------------------------------------------------------------------- #
# Kernel
# --------------------------------------------------------------------------- #
def ntm_topics_kernel(x_ref, wt_ref, o_ref, m_ref, l_ref, *,
                      num_v, block_v, valid_v):
    # x_ref:  (block_b, K)   batch tile of topic-space inputs (resident over j)
    # wt_ref: (K, block_v)   vocab tile of the pre-transposed weight
    # o_ref:  (block_b, V)   full-vocab output row block (resident accumulator)
    # m_ref:  (block_b, 1)   running max      (VMEM scratch, f32)
    # l_ref:  (block_b, 1)   running sum-exp  (VMEM scratch, f32)
    j = pl.program_id(1)

    # Linear (no bias): logits tile = x @ W^T tile, f32 accumulation on the MXU.
    logits = jnp.dot(x_ref[...], wt_ref[...], preferred_element_type=jnp.float32)

    if num_v == 1:
        # Single vocab tile: merged stash + finalize.  One lane-dense write,
        # no scratch round trip (block_v == V, so no tail masking needed).
        m = jnp.max(logits, axis=-1, keepdims=True)
        lse = m + jnp.log(jnp.sum(jnp.exp(logits - m), axis=-1, keepdims=True))
        o_ref[...] = (logits - lse).astype(o_ref.dtype)
        return

    head = (num_v - 1) * block_v      # static: columns already stashed
    tail = valid_v - head             # static: valid width of the last tile

    # Mask the padded vocab tail (only the last tile can be partially valid).
    if tail != block_v:
        col = j * block_v + jax.lax.broadcasted_iota(jnp.int32, logits.shape, 1)
        logits = jnp.where(col < valid_v, logits, -jnp.inf)

    @pl.when(j == 0)
    def _init():
        m_ref[...] = jnp.full(m_ref.shape, -jnp.inf, dtype=m_ref.dtype)
        l_ref[...] = jnp.zeros(l_ref.shape, dtype=l_ref.dtype)

    # Online (streaming) log-sum-exp update.
    m_prev = m_ref[...]
    m_new = jnp.maximum(m_prev, jnp.max(logits, axis=-1, keepdims=True))
    l_ref[...] = l_ref[...] * jnp.exp(m_prev - m_new) + jnp.sum(
        jnp.exp(logits - m_new), axis=-1, keepdims=True)
    m_ref[...] = m_new

    # Stash raw logits for every tile except the last one (VMEM-only traffic;
    # the single HBM writeback happens when the resident block retires).
    @pl.when(j < num_v - 1)
    def _stash():
        off = pl.multiple_of(j * block_v, 128)
        o_ref[:, pl.ds(off, block_v)] = logits.astype(o_ref.dtype)

    # Finalize on the last vocab step: apply lse to the just-computed last
    # tile directly (no stash->reload) and RMW only the head columns.
    @pl.when(j == num_v - 1)
    def _finalize():
        lse = m_ref[...] + jnp.log(l_ref[...])
        o_ref[:, pl.ds(0, head)] = o_ref[:, pl.ds(0, head)] - lse
        off = pl.multiple_of(head, 128)
        o_ref[:, pl.ds(off, tail)] = (logits[:, :tail] - lse).astype(o_ref.dtype)


# --------------------------------------------------------------------------- #
# Block / VMEM sizing (generation-aware)
# --------------------------------------------------------------------------- #
def _round_up(x, m):
    return (x + m - 1) // m * m


def _vmem_capacity_bytes():
    try:
        info = pltpu.get_tpu_info()
        cap = getattr(info, "vmem_capacity_bytes", None)
        if cap:
            return int(cap)
    except Exception:
        pass
    return 64 * 1024 * 1024  # conservative: v7x physical VMEM


def _device_kind():
    try:
        return jax.devices()[0].device_kind.lower()
    except Exception:
        return ""


def _choose_blocks(B, K, V, vmem_bytes, kind):
    is_v5 = "v5" in kind
    is_v7 = ("v7" in kind) or vmem_bytes <= 64 * 1024 * 1024
    mxu_rows = 128 if is_v5 else 256   # v5e MXU is 128-wide; v6e/v7x are 256

    # Vocab tile: big (the weight tile is only K*block_v*4 B and K is tiny for
    # topic models) to amortize the ~0.35 us/step overhead.
    block_v = V if V <= 8192 else 8192

    # Batch tile: fill the MXU rows; whole batch for small B.
    block_b = B if B <= mxu_rows else mxu_rows

    # v7x has 2 TensorCores: make the "parallel" batch axis at least 2 blocks
    # when there is enough work to split.
    if is_v7 and B > 64 and -(-B // block_b) < 2:
        block_b = min(block_b, _round_up(-(-B // 2), 8))

    # VMEM budget: double-buffered x/weight tiles + double-buffered resident
    # (block_b, V) output block + small scratch.  Shrink block_b to fit.
    budget = max(32 * 1024 * 1024, vmem_bytes - 16 * 1024 * 1024)

    def vmem_need(bb):
        return 4 * (2 * bb * K + 2 * K * block_v + 2 * bb * V) + (1 << 20)

    while block_b > 8 and vmem_need(block_b) > budget:
        nb = max(8, ((block_b // 2) // 8) * 8)
        if nb == block_b:
            break
        block_b = nb
    # TODO(synk): for vocabularies so large that even block_b=8 does not fit
    # (2*8*V*4 > budget), switch to the two-pass design (pass 1: streamed LSE,
    # pass 2: recompute logits and write logits-lse tile-by-tile).

    return block_b, block_v, budget


# --------------------------------------------------------------------------- #
# Forward wrapper
# --------------------------------------------------------------------------- #
@functools.partial(jax.jit, static_argnames=("block_b", "block_v"))
def ntm_topics_forward(x, weight_t, block_b=None, block_v=None):
    """x: (B, K) f32, weight_t: (K, V) f32 (pre-transposed) -> (B, V) f32."""
    B, K = x.shape
    K2, V = weight_t.shape
    assert K == K2, (K, K2)

    vmem_bytes = _vmem_capacity_bytes()
    kind = _device_kind()
    auto_b, auto_v, budget = _choose_blocks(B, K, V, vmem_bytes, kind)

    # Sanitize / default block sizes so layout constraints always hold:
    #   block_v < V  => block_v is a multiple of 128 (lane granule + the
    #                   pl.multiple_of hint in the kernel stays true)
    #   block_b < B  => block_b is a multiple of 8 (sublane granule)
    if block_v is None:
        block_v = auto_v
    if block_v >= V:
        block_v = V
    else:
        block_v = max(128, _round_up(block_v, 128))
        if block_v >= V:
            block_v = V

    if block_b is None:
        block_b = auto_b
    if block_b >= B:
        block_b = B
    else:
        block_b = max(8, _round_up(block_b, 8))
        if block_b >= B:
            block_b = B

    num_b = pl.cdiv(B, block_b)
    num_v = pl.cdiv(V, block_v)

    kernel = functools.partial(
        ntm_topics_kernel, num_v=num_v, block_v=block_v, valid_v=V)

    # Streamed weight tiles are tiny (K*block_v*4 B); with many vocab steps a
    # third buffer cheaply hides DMA latency behind the short per-step compute.
    if num_v >= 3:
        w_spec = pl.BlockSpec((K, block_v), lambda i, j: (0, j),
                              pipeline_mode=pl.Buffered(3))
    else:
        w_spec = pl.BlockSpec((K, block_v), lambda i, j: (0, j))

    vmem_limit = int(min(budget, max(32 * 1024 * 1024,
                                     vmem_bytes - 16 * 1024 * 1024)))

    return pl.pallas_call(
        kernel,
        out_shape=jax.ShapeDtypeStruct((B, V), jnp.float32),
        grid_spec=pltpu.PrefetchScalarGridSpec(
            num_scalar_prefetch=0,
            grid=(num_b, num_v),          # vocab (reduction) axis last
            in_specs=[
                pl.BlockSpec((block_b, K), lambda i, j: (i, 0)),
                w_spec,
            ],
            out_specs=pl.BlockSpec((block_b, V), lambda i, j: (i, 0)),
            scratch_shapes=[
                pltpu.VMEM((block_b, 1), jnp.float32),   # running max
                pltpu.VMEM((block_b, 1), jnp.float32),   # running sum-exp
            ],
        ),
        compiler_params=pltpu.CompilerParams(
            dimension_semantics=("parallel", "arbitrary"),
            vmem_limit_bytes=vmem_limit,
        ),
    )(x, weight_t)


def prepare_topic_weight(weight):
    """One-time parameter prep: store nn.Linear's (V, K) weight as (K, V)."""
    return jnp.asarray(weight).T


def ref_forward(x, weight):
    logits = x @ weight.T
    return jax.nn.log_softmax(logits, axis=-1)


if __name__ == "__main__":
    # Small shapes consistent with NTMTopics(k, vocab_size).
    k = 32
    vocab_size = 256
    batch = 16

    key = jax.random.PRNGKey(0)
    k_w, k_x = jax.random.split(key)

    # Deterministic xavier_normal_ init for nn.Linear(k, vocab_size).weight,
    # shape (vocab_size, k): std = sqrt(2 / (fan_in + fan_out)).
    std = (2.0 / (k + vocab_size)) ** 0.5
    weight = std * jax.random.normal(k_w, (vocab_size, k), dtype=jnp.float32)
    x = jax.random.normal(k_x, (batch, k), dtype=jnp.float32)

    # Parameter-prep transpose, done once (outside the per-call forward path).
    weight_t = jax.block_until_ready(prepare_topic_weight(weight))

    out = ntm_topics_forward(x, weight_t)
    out = jax.block_until_ready(out)

    # Correctness check against the pure-JAX reference.
    expected = ref_forward(x, weight)
    assert out.shape == (batch, vocab_size)
    max_err = float(jnp.max(jnp.abs(out - expected)))
    assert jnp.allclose(out, expected, atol=1e-5, rtol=1e-5), max_err
    # log_softmax rows should exponentiate-and-sum to ~1.
    assert jnp.allclose(jnp.sum(jnp.exp(out), axis=-1), 1.0, atol=1e-4)

    # Also exercise the multi-vocab-tile (streaming LSE + tail-mask) path with
    # a non-multiple-of-128 vocab, forcing num_v > 1 via a small block_v.
    v2 = 300
    w2 = std * jax.random.normal(k_w, (v2, k), dtype=jnp.float32)
    out2 = jax.block_until_ready(
        ntm_topics_forward(x, prepare_topic_weight(w2), block_v=128))
    exp2 = ref_forward(x, w2)
    assert jnp.allclose(out2, exp2, atol=1e-5, rtol=1e-5), float(
        jnp.max(jnp.abs(out2 - exp2)))

    print("KERNEL_OK")
</pallas_src>

<mosaic_0001>
module attributes {stable_mosaic.version = 11 : i64} {
  func.func @ntm_topics_kernel(%arg0: i32, %arg1: i32, %arg2: memref<16x32xf32, #tpu.memory_space<vmem>>, %arg3: memref<32x256xf32, #tpu.memory_space<vmem>>, %arg4: memref<16x256xf32, #tpu.memory_space<vmem>>, %arg5: memref<16x1xf32, #tpu.memory_space<vmem>>, %arg6: memref<16x1xf32, #tpu.memory_space<vmem>>) attributes {dimension_semantics = [#tpu.dimension_semantics<parallel>, #tpu.dimension_semantics<arbitrary>], iteration_bounds = array<i64: 1, 1>, scalar_prefetch = 0 : i64, scratch_operands = 2 : i64, tpu.core_type = #tpu.core_type<tc>, window_params = [{transform_indices = @transform_0, window_bounds = array<i64: 16, 32>}, {transform_indices = @transform_1, window_bounds = array<i64: 32, 256>}, {transform_indices = @transform_2, window_bounds = array<i64: 16, 256>}]} {
    %c0 = arith.constant 0 : index
    %c0_0 = arith.constant 0 : index
    %0 = vector.load %arg2[%c0, %c0_0] : memref<16x32xf32, #tpu.memory_space<vmem>>, vector<16x32xf32>
    %c0_1 = arith.constant 0 : index
    %c0_2 = arith.constant 0 : index
    %1 = vector.load %arg3[%c0_1, %c0_2] : memref<32x256xf32, #tpu.memory_space<vmem>>, vector<32x256xf32>
    %cst = arith.constant dense<0.000000e+00> : vector<16x256xf32>
    %2 = tpu.matmul %0, %1, %cst {dimension_numbers = #tpu.dot_dimension_numbers<[1], [0], [0], [1], [0, 0, 1, 1], [], []>} : vector<16x32xf32>, vector<32x256xf32>, vector<16x256xf32> -> vector<16x256xf32>
    %cst_3 = arith.constant dense<0xFF800000> : vector<16xf32>
    %3 = vector.multi_reduction <maximumf>, %2, %cst_3 [1] : vector<16x256xf32> to vector<16xf32>
    %4 = vector.shape_cast %3 : vector<16xf32> to vector<16x1xf32>
    %5 = vector.broadcast %4 : vector<16x1xf32> to vector<16x256xf32>
    %6 = arith.subf %2, %5 : vector<16x256xf32>
    %7 = math.exp %6 : vector<16x256xf32>
    %cst_4 = arith.constant dense<0.000000e+00> : vector<16xf32>
    %8 = vector.multi_reduction <add>, %7, %cst_4 [1] : vector<16x256xf32> to vector<16xf32>
    %9 = vector.shape_cast %8 : vector<16xf32> to vector<16x1xf32>
    %10 = math.log %9 : vector<16x1xf32>
    %11 = arith.addf %4, %10 : vector<16x1xf32>
    %12 = vector.broadcast %11 : vector<16x1xf32> to vector<16x256xf32>
    %13 = arith.subf %2, %12 : vector<16x256xf32>
    %c0_5 = arith.constant 0 : index
    %c0_6 = arith.constant 0 : index
    %14 = vector.load %arg4[%c0_5, %c0_6] : memref<16x256xf32, #tpu.memory_space<vmem>>, vector<16x256xf32>
    tpu.vector_store %arg4[%c0_5, %c0_6], %13 {strides = array<i32>} : memref<16x256xf32, #tpu.memory_space<vmem>>, vector<16x256xf32>,
    return
  }
  func.func @transform_0(%arg0: i32, %arg1: i32) -> (i32, i32) {
    %c0_i32 = arith.constant 0 : i32
    %c0_i32_0 = arith.constant 0 : i32
    return %arg0, %c0_i32 : i32, i32
  }
  func.func @transform_1(%arg0: i32, %arg1: i32) -> (i32, i32) {
    %c0_i32 = arith.constant 0 : i32
    %c0_i32_0 = arith.constant 0 : i32
    return %c0_i32, %arg1 : i32, i32
  }
  func.func @transform_2(%arg0: i32, %arg1: i32) -> (i32, i32) {
    %c0_i32 = arith.constant 0 : i32
    %c0_i32_0 = arith.constant 0 : i32
    return %arg0, %c0_i32 : i32, i32
  }
}

</mosaic_0001>

<bundles_post_ra>
// kernel: ntm_topics_forward.1
= control target key start
LH: loop header
LB: loop body
LE: loop exit
PB: predicated region body
PF: predicated region fallthrough
CT: control target
= control target key end

     0   :  { %7 = vsyncpa [#allocation5], 0  ;;  %s311_s0 = inlined_call_operand.hbm [shape: f32[16,32], index: 0, kind: input, shape index: {}]   ;;  %s312_s1 = inlined_call_operand.hbm [shape: f32[32,256], index: 1, kind: input, shape index: {}]   ;;  %s313_s2 = inlined_call_operand.hbm [shape: f32[16,256], index: 2, kind: output, shape index: {}]  }
   0x1   :  { %8 = vsyncpa [#allocation8], 0 }
   0x2   :  { %9 = vsyncpa [#allocation6], 0  ;;  %s14_s11 = sshll.u32 %s311_s0, 4  ;;  %s274_s12 = smov [#allocation4]   ;;  %s15_s11 = int_to_ptr.hbm [resolvable:$true] %s14_s11 }
   0x3   :  { %s16_s13 = sshll.u32 %s274_s12, 4  ;;  %s27_s16 = sshll.u32 %s312_s1, 4  ;;  %s17_s13 = int_to_ptr.vmem [resolvable:$true] %s16_s13  ;;  %s28_s16 = int_to_ptr.hbm [resolvable:$true] %s27_s16 }
   0x4   :  { %s275_s17 = smov 128   ;;  %s276_s18 = smov 8  }
   0x5   :  { %22 = dma.hbm_to_vmem [thread:$0]  %s15_s11, 256, %s17_s13, [#allocation5], %s275_s17, %s275_s17, %s276_s18  }
   0x6   :  { %s277_s19 = smov [#allocation7]   ;;  %s278_s21 = smov 256  }
   0x7   :  { %s29_s20 = sshll.u32 %s277_s19, 4  ;;  %s279_s22 = smov 16   ;;  %s30_s20 = int_to_ptr.vmem [resolvable:$true] %s29_s20 }
   0x8   :  { %35 = dma.hbm_to_vmem [thread:$0]  %s28_s16, 1024, %s30_s20, [#allocation8], %s278_s21, %s278_s21, %s279_s22  }
   0x9   :  { %268 = dma.done.wait [#allocation5], 256  }
   0xa   :  { %269 = vsyncadd [#allocation5], 4294967040 }
   0xb   :  { %270 = dma.done.wait [#allocation8], 1024  }
   0xc   :  { %271 = vsyncadd [#allocation8], 4294966272  ;;  %v52_v0 = vld [vmem:[#allocation7 + $0x30] sm:$0xff]  ;;  %v53_v1 = vld [vmem:[#allocation7 + $0x38] sm:$0xff]  ;;  %vm54_vm0 = vcmask 261120   ;;  %s280_s0 = smov [#allocation9]  }
   0xd   :  { %v50_v2 = vld [vmem:[#allocation7 + $0x20] sm:$0xff]  ;;  %73 = vmatpush.msra.mxu0 %v52_v0  ;;  %96 = vmatpush.msra.mxu1 %v53_v1  ;;  %v51_v3 = vld [vmem:[#allocation7 + $0x28] sm:$0xff]  ;;  %v48_v4 = vld [vmem:[#allocation7 + $0x10] sm:$0xff]  ;;  %s149_s1 = sshll.u32 %s280_s0, 4  ;;  %s151_s25 = sshll.u32 %s313_s2, 4  ;;  %s150_s1 = int_to_ptr.vmem [resolvable:$true] %s149_s1  ;;  %s152_s25 = int_to_ptr.hbm [resolvable:$true] %s151_s25 }
   0xe   :  { %169 = vmatpush.msra.mxu2 %v52_v0  ;;  %173 = vmatpush.msra.mxu3 %v53_v1  ;;  %v49_v5 = vld [vmem:[#allocation7 + $0x18] sm:$0xff]  ;;  %v46_v6 = vld [vmem:[#allocation7] sm:$0xff]  ;;  %v47_v7 = vld [vmem:[#allocation7 + $0x8] sm:$0xff] }
   0xf   :  { %74 = vmatpush.msra.mxu0 %v50_v2  ;;  %97 = vmatpush.msra.mxu1 %v51_v3  ;;  %v44_v8 = vld [vmem:[#allocation4] sm:$0xff]  ;;  %v45_v9 = vld [vmem:[#allocation4 + $0x8] sm:$0xff] }
  0x10   :  { %170 = vmatpush.msra.mxu2 %v50_v2  ;;  %174 = vmatpush.msra.mxu3 %v51_v3 }
  0x11   :  { %75 = vmatpush.msra.mxu0 %v48_v4  ;;  %98 = vmatpush.msra.mxu1 %v49_v5 }
  0x12   :  { %171 = vmatpush.msra.mxu2 %v48_v4  ;;  %175 = vmatpush.msra.mxu3 %v49_v5 }
  0x13   :  { %76 = vmatpush.msra.mxu0 %v46_v6  ;;  %99 = vmatpush.msra.mxu1 %v47_v7 }
  0x14   :  { %165 = vmatmul.msk.f32.vlgmr.msra.gmra.mxu0 %vm54_vm0, %v44_v8  ;;  %167 = vmatmul.msk.f32.vlgmr.msra.gmra.mxu1 %vm54_vm0, %v44_v8 }
  0x15   :  { %172 = vmatpush.msra.mxu2 %v46_v6  ;;  %176 = vmatpush.msra.mxu3 %v47_v7 }
  0x16   :  { %166 = vmatmul.msk.f32.vlgmr.msra.gmra.mxu2 %vm54_vm0, %v45_v9  ;;  %168 = vmatmul.msk.f32.vlgmr.msra.gmra.mxu3 %vm54_vm0, %v45_v9 }
  0x91   :  { %v78_v10 = vpop.f32.mrf.mxu0  ;;  %v101_v11 = vpop.f32.mrf.mxu1 }
  0x92   :  { %v107_v12 = vmax.f32 %v78_v10, %v101_v11 }
  0x94   :  { %108 = vmax.xlane.f32.xlu0 %v107_v12 }
  0x99   :  { %v81_v13 = vpop.f32.mrf.mxu2  ;;  %v104_v14 = vpop.f32.mrf.mxu3 }
  0x9a   :  { %v110_v15 = vmax.f32 %v81_v13, %v104_v14 }
  0x9c   :  { %111 = vmax.xlane.f32.xlu0 %v110_v15 }
 0x107   :  { %v109_v16 = vpop.xlane.xlu0 %108 }
 0x108   :  { %v113_v17 = vsub.f32 %v78_v10, %v109_v16  ;;  %v114_v18 = vsub.f32 %v101_v11, %v109_v16 }
 0x10a   :  { %v117_v19 = vmul.f32 1.442695, %v113_v17  ;;  %v119_v20 = vmul.f32 1.442695, %v114_v18 }
 0x10c   :  { %184 = vpow2.f32 %v117_v19 }
 0x10d   :  { %186 = vpow2.f32 %v119_v20 }
 0x10f   :  { %v112_v21 = vpop.xlane.xlu0 %111 }
 0x110   :  { %v115_v22 = vsub.f32 %v81_v13, %v112_v21  ;;  %v116_v23 = vsub.f32 %v104_v14, %v112_v21 }
 0x112   :  { %v185_v24 = vpop.eup %184  ;;  %v121_v25 = vmul.f32 1.442695, %v115_v22  ;;  %v123_v26 = vmul.f32 1.442695, %v116_v23 }
 0x113   :  { %v187_v27 = vpop.eup %186 }
 0x114   :  { %188 = vpow2.f32 %v121_v25  ;;  %v125_v28 = vadd.f32 %v187_v27, %v185_v24 }
 0x115   :  { %190 = vpow2.f32 %v123_v26 }
 0x116   :  { %126 = vadd.xlane.f32.xlu1 %v125_v28 }
 0x11a   :  { %v189_v29 = vpop.eup %188 }
 0x11b   :  { %v191_v30 = vpop.eup %190 }
 0x11c   :  { %v128_v31 = vadd.f32 %v191_v30, %v189_v29 }
 0x11e   :  { %129 = vadd.xlane.f32.xlu1 %v128_v31 }
 0x189   :  { %v127_v32 = vpop.xlane.xlu1 %126 }
 0x18a   :  { %192 = vlog2.f32 %v127_v32 }
 0x190   :  { %v193_v33 = vpop.eup %192 }
 0x191   :  { %v132_v34 = vmul.f32 0.6931472, %v193_v33  ;;  %v130_v35 = vpop.xlane.xlu1 %129 }
 0x192   :  { %194 = vlog2.f32 %v130_v35 }
 0x193   :  { %v135_v36 = vadd.f32 %v132_v34, %v109_v16 }
 0x195   :  { %v137_v37 = vsub.f32 %v78_v10, %v135_v36  ;;  %v138_v38 = vsub.f32 %v101_v11, %v135_v36 }
 0x197   :  { %141 = vst [vmem:[#allocation9] sm:$0xff] %v137_v37 }
 0x198   :  { %v195_v39 = vpop.eup %194  ;;  %142 = vst [vmem:[#allocation9 + $0x8] sm:$0xff] %v138_v38 }
 0x199   :  { %v134_v40 = vmul.f32 0.6931472, %v195_v39 }
 0x19b   :  { %v136_v41 = vadd.f32 %v134_v40, %v112_v21 }
 0x19d   :  { %v139_v42 = vsub.f32 %v81_v13, %v136_v41  ;;  %v140_v43 = vsub.f32 %v104_v14, %v136_v41 }
 0x19f   :  { %143 = vst [vmem:[#allocation9 + $0x10] sm:$0xff] %v139_v42 }
 0x1a0   :  { %144 = vst [vmem:[#allocation9 + $0x18] sm:$0xff] %v140_v43 }
 0x1a1   :  { %157 = dma.vmem_to_hbm [thread:$0]  %s150_s1, 512, %s152_s25, [#allocation6], %s278_s21, %s278_s21, %s279_s22  }
 0x1a2   :  { %272 = dma.done.wait [#allocation6], 512  }
 0x1a3   :  { %273 = vsyncadd [#allocation6], 4294966784 }
 0x1a4   :  { %162 = vsyncpa [#allocation5], 1 }
 0x1a5   :  { %163 = vsyncpa [#allocation8], 1 }
 0x1a6   :  { %164 = vsyncpa [#allocation6], 1 }

</bundles_post_ra>
